<compile_context>
chip_gen: v6e
topology: v6e:2x2x1
jax: 0.10.0
libtpu: 0.0.40
codegen_flags: <defaults>
</compile_context>

<pallas_src>
import functools
import math

import jax
import jax.numpy as jnp
from jax import lax
from jax.experimental import pallas as pl
from jax.experimental.pallas import tpu as pltpu

_OUT_SUB, _OUT_LANE = 8, 128  # aligned (sublane, lane) tile for per-block partials


def _hinge_disc_kernel(*refs, rows_total: int, mt: int,
                       has_weight: bool, ragged: bool):
    if has_weight:
        real_ref, fake_ref, w_ref, pr_ref, pf_ref = refs
    else:
        real_ref, fake_ref, pr_ref, pf_ref = refs

    r = real_ref[...]                                   # (mt, hwt), native dtype
    f = fake_ref[...]
    one = jnp.asarray(1.0, dtype=r.dtype)
    zero = jnp.asarray(0.0, dtype=r.dtype)

    # Hinge terms in the input dtype (bf16 stays bf16 on v6e/v7x), accumulate f32.
    cr = jnp.minimum(r - one, zero).astype(jnp.float32)
    cf = jnp.minimum(-f - one, zero).astype(jnp.float32)

    if ragged:
        # Only emitted when no exact row divisor was found: zero the
        # out-of-bounds rows of the last row-block.
        i = pl.program_id(0)
        row_ids = i * mt + lax.broadcasted_iota(jnp.int32, (mt, 1), 0)
        valid = row_ids < rows_total                    # (mt, 1) -> broadcast
        cr = jnp.where(valid, cr, 0.0)
        cf = jnp.where(valid, cf, 0.0)

    if has_weight:
        # Column-sum first (XLU), then a single (1, hwt) multiply by the weight
        # row: hwt VPU multiplies instead of mt*hwt (weight is row-broadcast).
        w = w_ref[...].astype(jnp.float32)              # (1, hwt)
        col_r = jnp.sum(cr, axis=0, keepdims=True)
        col_f = jnp.sum(cf, axis=0, keepdims=True)
        pr = jnp.sum(col_r * w)
        pf = jnp.sum(col_f * w)
    else:
        pr = jnp.sum(cr)
        pf = jnp.sum(cf)

    # Per-block partial sums into an aligned (8, 128) output tile.
    pr_ref[...] = jnp.broadcast_to(pr, pr_ref.shape)
    pf_ref[...] = jnp.broadcast_to(pf, pf_ref.shape)


def _round_up(x: int, m: int) -> int:
    return ((x + m - 1) // m) * m


def _pick_row_block(rows: int, target_rows: int, pack: int):
    """Largest multiple of `pack` <= target_rows that divides rows (searching
    down to target/2); otherwise the target itself (ragged tail)."""
    target = max(pack, (target_rows // pack) * pack)
    lo = max(pack, target // 2)
    for cand in range(target, lo - 1, -pack):
        if rows % cand == 0:
            return cand, False
    return target, (rows % target != 0)


def hinge_discriminator_loss(prediction_real, prediction_fake, weight=None,
                             *, target_block_bytes=6 * 1024 * 1024):
    """Pallas-backed hinge discriminator loss.

    prediction_real / prediction_fake: (..., H, W)  (e.g. (B, C, T, H, W))
    weight: (H, W) map or None
    returns: (loss_real, loss_fake) scalar float32
    """
    assert prediction_real.shape == prediction_fake.shape
    *lead, H, W = prediction_real.shape
    HW = H * W
    M = math.prod(lead) if lead else 1
    N = M * HW
    dtype = prediction_real.dtype
    itemsize = jnp.dtype(dtype).itemsize
    pack = max(8, 32 // itemsize)        # sublane packing: f32->8, bf16->16, i8->32
    has_weight = weight is not None

    # ---- lane-dense (rows, cols) layout ---------------------------------
    if has_weight or HW % 128 == 0:
        # Weighted path must keep lane dim == HW so the weight row broadcasts.
        # TODO(synk): weighted path with HW % 128 != 0 pads lanes (correct but
        # wastes bandwidth); a per-tile weight gather would avoid it.
        rows, cols = M, HW
    else:
        # Weight-free: re-slab the flat array onto a 128-aligned lane width.
        cols = HW
        if N % 128 == 0:
            cap = (min(N, 4096) // 128) * 128
            for cand in range(cap, 127, -128):
                if N % cand == 0:
                    cols = cand
                    break
        rows = N // cols

    real = prediction_real.reshape(rows, cols)   # metadata-only reshapes
    fake = prediction_fake.reshape(rows, cols)

    # ---- lane (column) blocking: VMEM guard for large spatial sizes ------
    if cols % 128 == 0 and cols * itemsize * pack > target_block_bytes:
        hwt_max = max(128, ((target_block_bytes // (pack * itemsize)) // 128) * 128)
        hwt = 128
        for cand in range(min(hwt_max, cols), 127, -128):
            if cols % cand == 0:
                hwt = cand
                break
    else:
        hwt = cols
    gc = cols // hwt                                   # exact by construction

    # ---- row blocking -----------------------------------------------------
    rows_fit = max(1, target_block_bytes // (hwt * itemsize))
    ragged = False
    if rows <= pack:
        mt = rows                                      # single tiny block
    elif rows <= rows_fit:
        # Whole problem fits one block: still split into >= 2 row blocks so the
        # parallel grid can shard across both v7x TensorCores.
        mt, ragged = _pick_row_block(rows, _round_up(-(-rows // 2), pack), pack)
    else:
        mt, ragged = _pick_row_block(rows, rows_fit, pack)
    gm = pl.cdiv(rows, mt)
    grid = (gm, gc)

    # ---- specs / operands --------------------------------------------------
    in_specs = [
        pl.BlockSpec((mt, hwt), lambda i, j: (i, j)),   # real block
        pl.BlockSpec((mt, hwt), lambda i, j: (i, j)),   # fake block
    ]
    operands = [real, fake]
    if has_weight:
        operands.append(weight.reshape(1, cols))
        in_specs.append(pl.BlockSpec((1, hwt), lambda i, j: (0, j)))  # weight row

    out_shape = (
        jax.ShapeDtypeStruct((gm * _OUT_SUB, gc * _OUT_LANE), jnp.float32),
        jax.ShapeDtypeStruct((gm * _OUT_SUB, gc * _OUT_LANE), jnp.float32),
    )
    out_specs = [
        pl.BlockSpec((_OUT_SUB, _OUT_LANE), lambda i, j: (i, j)),
        pl.BlockSpec((_OUT_SUB, _OUT_LANE), lambda i, j: (i, j)),
    ]

    kernel = functools.partial(_hinge_disc_kernel, rows_total=rows, mt=mt,
                               has_weight=has_weight, ragged=ragged)

    # VMEM budget derived from the actual blocks (2 inputs x double buffer +
    # weight + 2 output tiles x double buffer), capped below v7x's 64 MiB.
    vmem_need = 2 * 2 * mt * hwt * itemsize
    vmem_need += 2 * hwt * itemsize if has_weight else 0
    vmem_need += 2 * 2 * _OUT_SUB * _OUT_LANE * 4
    vmem_limit = min(max(32 * 1024 * 1024, vmem_need + 8 * 1024 * 1024),
                     48 * 1024 * 1024)

    w_bytes = HW * jnp.dtype(weight.dtype).itemsize if has_weight else 0
    cost = pl.CostEstimate(
        flops=8 * N,
        transcendentals=0,
        bytes_accessed=int(2 * N * itemsize + w_bytes
                           + 2 * gm * _OUT_SUB * gc * _OUT_LANE * 4),
    )

    partials_r, partials_f = pl.pallas_call(
        kernel,
        grid_spec=pltpu.PrefetchScalarGridSpec(
            num_scalar_prefetch=0,
            grid=grid,
            in_specs=in_specs,
            out_specs=out_specs,
        ),
        out_shape=out_shape,
        compiler_params=pltpu.CompilerParams(
            dimension_semantics=("parallel", "parallel"),
            vmem_limit_bytes=vmem_limit,
        ),
        cost_estimate=cost,
    )(*operands)

    inv_n = 1.0 / float(N)
    loss_real = -jnp.sum(partials_r[0::_OUT_SUB, 0::_OUT_LANE]) * inv_n
    loss_fake = -jnp.sum(partials_f[0::_OUT_SUB, 0::_OUT_LANE]) * inv_n
    return loss_real, loss_fake


def _ref_hinge_loss(pr, pf, weight=None):
    """Pure-JAX reference mirroring the PyTorch module."""
    H, W = pr.shape[-2], pr.shape[-1]
    if weight is not None:
        wb = weight.reshape((1,) * (pr.ndim - 2) + (H, W))
        lr = -jnp.mean(jnp.minimum(0.0, pr - 1.0) * wb)
        lf = -jnp.mean(jnp.minimum(0.0, -pf - 1.0) * wb)
    else:
        lr = -jnp.mean(jnp.minimum(0.0, pr - 1.0))
        lf = -jnp.mean(jnp.minimum(0.0, -pf - 1.0))
    return lr, lf


if __name__ == "__main__":
    key = jax.random.PRNGKey(0)
    k1, k2, k3, k4, k5, k6, k7 = jax.random.split(key, 7)

    def check(got, want, name):
        gr, gf = got
        rr, rf = want
        assert jnp.allclose(gr, rr, atol=1e-5, rtol=1e-5), (name, gr, rr)
        assert jnp.allclose(gf, rf, atol=1e-5, rtol=1e-5), (name, gf, rf)

    # Multi-StyleGAN-style discriminator predictions (B, C, T, H, W) + (H, W) weight.
    B, C, T, H, W = 2, 4, 8, 16, 16        # rows M = 64, lanes HW = 256
    pr = jax.random.normal(k1, (B, C, T, H, W), dtype=jnp.float32)
    pf = jax.random.normal(k2, (B, C, T, H, W), dtype=jnp.float32)
    w = jax.random.uniform(k3, (H, W), dtype=jnp.float32)

    # 1) Weighted, default blocks: rows split into 2 -> grid (2, 1), megacore-friendly.
    out = hinge_discriminator_loss(pr, pf, w)
    jax.block_until_ready(out)
    check(out, _ref_hinge_loss(pr, pf, w), "weighted")

    # 2) weight=None: no weight DMA / multiply.
    out = hinge_discriminator_loss(pr, pf, None)
    jax.block_until_ready(out)
    check(out, _ref_hinge_loss(pr, pf, None), "unweighted")

    # 3) Multi-block rows with an exact divisor (ragged mask compiled out): grid (8, 1).
    out = hinge_discriminator_loss(pr, pf, w, target_block_bytes=8 * H * W * 4)
    jax.block_until_ready(out)
    check(out, _ref_hinge_loss(pr, pf, w), "multi-block exact")

    # 4) 2-D grid (row + lane blocking) with ragged rows: M = 20 -> grid (3, 2).
    pr2 = jax.random.normal(k4, (2, 2, 5, H, W), dtype=jnp.float32)
    pf2 = jax.random.normal(k5, (2, 2, 5, H, W), dtype=jnp.float32)
    out = hinge_discriminator_loss(pr2, pf2, w, target_block_bytes=4096)
    jax.block_until_ready(out)
    check(out, _ref_hinge_loss(pr2, pf2, w), "2d-grid ragged")

    # 5) weight=None with HW % 128 != 0: re-slabbed to a 128-aligned lane width.
    pr3 = jax.random.normal(k6, (2, 4, 8, 10, 10), dtype=jnp.float32)
    pf3 = jax.random.normal(k7, (2, 4, 8, 10, 10), dtype=jnp.float32)
    out = hinge_discriminator_loss(pr3, pf3, None)
    jax.block_until_ready(out)
    check(out, _ref_hinge_loss(pr3, pf3, None), "lane re-slab")

    print("KERNEL_OK")
</pallas_src>

<mosaic_0001>
module attributes {stable_mosaic.version = 11 : i64} {
  func.func @_hinge_disc_kernel(%arg0: i32, %arg1: i32, %arg2: memref<32x256xf32, #tpu.memory_space<vmem>>, %arg3: memref<32x256xf32, #tpu.memory_space<vmem>>, %arg4: memref<1x256xf32, #tpu.memory_space<vmem>>, %arg5: memref<8x128xf32, #tpu.memory_space<vmem>>, %arg6: memref<8x128xf32, #tpu.memory_space<vmem>>) attributes {dimension_semantics = [#tpu.dimension_semantics<parallel>, #tpu.dimension_semantics<parallel>], iteration_bounds = array<i64: 2, 1>, scalar_prefetch = 0 : i64, scratch_operands = 0 : i64, tpu.core_type = #tpu.core_type<tc>, window_params = [{transform_indices = @transform_0, window_bounds = array<i64: 32, 256>}, {transform_indices = @transform_1, window_bounds = array<i64: 32, 256>}, {transform_indices = @transform_2, window_bounds = array<i64: 1, 256>}, {transform_indices = @transform_3, window_bounds = array<i64: 8, 128>}, {transform_indices = @transform_4, window_bounds = array<i64: 8, 128>}]} {
    %c0 = arith.constant 0 : index
    %c0_0 = arith.constant 0 : index
    %0 = vector.load %arg2[%c0, %c0_0] : memref<32x256xf32, #tpu.memory_space<vmem>>, vector<32x256xf32>
    %c0_1 = arith.constant 0 : index
    %c0_2 = arith.constant 0 : index
    %1 = vector.load %arg3[%c0_1, %c0_2] : memref<32x256xf32, #tpu.memory_space<vmem>>, vector<32x256xf32>
    %cst = arith.constant 1.000000e+00 : f32
    %2 = vector.broadcast %cst : f32 to vector<32x256xf32>
    %3 = arith.subf %0, %2 : vector<32x256xf32>
    %cst_3 = arith.constant 0.000000e+00 : f32
    %4 = vector.broadcast %cst_3 : f32 to vector<32x256xf32>
    %5 = arith.minimumf %3, %4 : vector<32x256xf32>
    %cst_4 = arith.constant 0.000000e+00 : f32
    %6 = vector.broadcast %cst_4 : f32 to vector<32x256xf32>
    %7 = arith.subf %6, %1 : vector<32x256xf32>
    %cst_5 = arith.constant 1.000000e+00 : f32
    %8 = vector.broadcast %cst_5 : f32 to vector<32x256xf32>
    %9 = arith.subf %7, %8 : vector<32x256xf32>
    %cst_6 = arith.constant 0.000000e+00 : f32
    %10 = vector.broadcast %cst_6 : f32 to vector<32x256xf32>
    %11 = arith.minimumf %9, %10 : vector<32x256xf32>
    %c0_7 = arith.constant 0 : index
    %c0_8 = arith.constant 0 : index
    %12 = vector.load %arg4[%c0_7, %c0_8] : memref<1x256xf32, #tpu.memory_space<vmem>>, vector<1x256xf32>
    %cst_9 = arith.constant dense<0.000000e+00> : vector<256xf32>
    %13 = vector.multi_reduction <add>, %5, %cst_9 [0] : vector<32x256xf32> to vector<256xf32>
    %14 = vector.shape_cast %13 : vector<256xf32> to vector<1x256xf32>
    %cst_10 = arith.constant dense<0.000000e+00> : vector<256xf32>
    %15 = vector.multi_reduction <add>, %11, %cst_10 [0] : vector<32x256xf32> to vector<256xf32>
    %16 = vector.shape_cast %15 : vector<256xf32> to vector<1x256xf32>
    %17 = arith.mulf %14, %12 : vector<1x256xf32>
    %18 = vector.shape_cast %17 : vector<1x256xf32> to vector<1x1x256xf32>
    %cst_11 = arith.constant dense<0.000000e+00> : vector<1xf32>
    %19 = vector.multi_reduction <add>, %18, %cst_11 [1, 2] : vector<1x1x256xf32> to vector<1xf32>
    %20 = vector.shape_cast %19 : vector<1xf32> to vector<1x1x1xf32>
    %21 = vector.extract %20[0, 0, 0] : f32 from vector<1x1x1xf32>
    %22 = arith.mulf %16, %12 : vector<1x256xf32>
    %23 = vector.shape_cast %22 : vector<1x256xf32> to vector<1x1x256xf32>
    %cst_12 = arith.constant dense<0.000000e+00> : vector<1xf32>
    %24 = vector.multi_reduction <add>, %23, %cst_12 [1, 2] : vector<1x1x256xf32> to vector<1xf32>
    %25 = vector.shape_cast %24 : vector<1xf32> to vector<1x1x1xf32>
    %26 = vector.extract %25[0, 0, 0] : f32 from vector<1x1x1xf32>
    %27 = vector.broadcast %21 : f32 to vector<8x128xf32>
    %c0_13 = arith.constant 0 : index
    %c0_14 = arith.constant 0 : index
    %28 = vector.load %arg5[%c0_13, %c0_14] : memref<8x128xf32, #tpu.memory_space<vmem>>, vector<8x128xf32>
    tpu.vector_store %arg5[%c0_13, %c0_14], %27 {strides = array<i32>} : memref<8x128xf32, #tpu.memory_space<vmem>>, vector<8x128xf32>,
    %29 = vector.broadcast %26 : f32 to vector<8x128xf32>
    %c0_15 = arith.constant 0 : index
    %c0_16 = arith.constant 0 : index
    %30 = vector.load %arg6[%c0_15, %c0_16] : memref<8x128xf32, #tpu.memory_space<vmem>>, vector<8x128xf32>
    tpu.vector_store %arg6[%c0_15, %c0_16], %29 {strides = array<i32>} : memref<8x128xf32, #tpu.memory_space<vmem>>, vector<8x128xf32>,
    return
  }
  func.func @transform_0(%arg0: i32, %arg1: i32) -> (i32, i32) {
    %c0_i32 = arith.constant 0 : i32
    return %arg0, %arg1 : i32, i32
  }
  func.func @transform_1(%arg0: i32, %arg1: i32) -> (i32, i32) {
    %c0_i32 = arith.constant 0 : i32
    return %arg0, %arg1 : i32, i32
  }
  func.func @transform_2(%arg0: i32, %arg1: i32) -> (i32, i32) {
    %c0_i32 = arith.constant 0 : i32
    %c0_i32_0 = arith.constant 0 : i32
    return %c0_i32, %arg1 : i32, i32
  }
  func.func @transform_3(%arg0: i32, %arg1: i32) -> (i32, i32) {
    %c0_i32 = arith.constant 0 : i32
    return %arg0, %arg1 : i32, i32
  }
  func.func @transform_4(%arg0: i32, %arg1: i32) -> (i32, i32) {
    %c0_i32 = arith.constant 0 : i32
    return %arg0, %arg1 : i32, i32
  }
}

</mosaic_0001>

<bundles_post_ra>
// kernel: tpu_custom_call.1
= control target key start
LH: loop header
LB: loop body
LE: loop exit
PB: predicated region body
PF: predicated region fallthrough
CT: control target
= control target key end

     0   :  { %s1186_s0 = inlined_call_operand.hbm [shape: f32[64,256], index: 0, kind: input, shape index: {}]   ;;  %s1187_s1 = inlined_call_operand.hbm [shape: f32[64,256], index: 1, kind: input, shape index: {}]   ;;  %s1188_s2 = inlined_call_operand.vmem [shape: f32[1,256], index: 2, kind: input, shape index: {}]   ;;  %s1189_s3 = inlined_call_operand.hbm [shape: f32[16,128], index: 3, kind: output, shape index: {0}]   ;;  %s1190_s4 = inlined_call_operand.hbm [shape: f32[16,128], index: 4, kind: output, shape index: {1}]  }
   0x1   :  { %1192 = sst [smem:[#allocation15_spill]] %s1186_s0 }
   0x2   :  { %10 = vsyncpa [#allocation3], 0 }
   0x3   :  { %12 = vsyncpa [#allocation3 + $0x1], 0 }
   0x4   :  { %13 = vsyncpa [#allocation6], 0 }
   0x5   :  { %15 = vsyncpa [#allocation6 + $0x1], 0 }
   0x6   :  { %16 = vsyncpa [#allocation4], 0 }
   0x7   :  { %18 = vsyncpa [#allocation4 + $0x1], 0 }
   0x8   :  { %19 = vsyncpa [#allocation9], 0 }
   0x9   :  { %21 = vsyncpa [#allocation9 + $0x1], 0  ;;  %s965_s15 = smov 0   ;;  %s967_s16 = smov 0  }
   0xa   :  { %s969_s17 = smov 0   ;;  %s971_s18 = smov 0  }
   0xb   :  { %s973_s19 = smov 0   ;;  %s975_s20 = smov 0  }
   0xc LB: > { %s640_s21 = sadd.s32 4294967295, %s932_s20   ;;  %s641_s22 = sadd.s32 4294967294, %s932_s20   ;;  %s932_s20 = sphi %s975_s20, %s27_s20   ;;  %s928_s19 = sphi %s973_s19, %s1207_s19   ;;  %s924_s18 = sphi %s971_s18, %s1206_s18   ;;  %s920_s17 = sphi %s969_s17, %s1205_s17   ;;  %s916_s16 = sphi %s967_s16, %s1204_s16   ;;  %s912_s15 = sphi %s965_s15, %s1203_s15  }
   0xd   : > { %s39_s23 = sadd.s32 1, %s928_s19  ;;  %s48_s24 = sadd.s32 1, %s920_s17 }
   0xe   : > { %p41_p0 = scmp.ge.s32.totalorder %s39_s23, 2  ;;  %p55_p1 = scmp.ne.s32.totalorder %s920_s17, %s916_s16 }
   0xf   : > { %p56_p2 = scmp.eq.s32.totalorder %s932_s20, 0  ;;  %p61_p3 = scmp.ne.s32.totalorder %s916_s16, %s912_s15 }
  0x10   : > { %s1209_s23 = smov (%p41_p0, %s39_s23), 0  ;;  %p62_p5 = scmp.eq.s32.totalorder %s640_s21, 0 }
  0x11   : > { %1193 = sst [smem:[#allocation14_spill]] %s1209_s23  ;;  %p1006_p4 = por %p56_p2, %p55_p1 }
  0x12   : > { %s43_s26 = ssub.s32 %s928_s19, %s1209_s23  ;;  %p141_p6 = scmp.eq.s32.totalorder %s640_s21, 1 }
  0x13   : > { %p46_p7 = scmp.eq.s32.totalorder %s43_s26, 0  ;;  %p1012_p8 = por %p62_p5, %p61_p3 }
  0x14   : > { %p1016_p9 = por %p141_p6, %p55_p1  ;;  %p147_p10 = scmp.eq.s32.totalorder %s641_s22, 1 }
  0x15   : > { %s1021_s29 = scalar_select %p46_p7, %s920_s17, %s48_s24  }
  0x16   : > { %p1023_p11 = por %p147_p10, %p61_p3  ;;  %p710_p13 = scmp.lt.s32.totalorder %s932_s20, 2 }
  0x17   : > { %s1030_s5 = sand.u32 1, %s920_s17   ;;  %s681_s7 = sshll.u32 %s928_s19, 10 }
  0x18   : > { %s645_s6 = sshll.u32 %s1030_s5, 6  ;;  %s1198_s0 = sld [smem:[#allocation15_spill]] }
  0x19   : > { %s207_s11 = scalar_lea.vmem [#allocation2], %s645_s6  ;;  %p1043_p0 = pnand %p710_p13, %p1006_p4 }
  0x1a   : > { %s217_s12 = sshll.u32 %s207_s11, 4  ;;  %p653_p1 = scmp.ge.s32.totalorder %s932_s20, 1  ;;  %s218_s12 = int_to_ptr.vmem [resolvable:$true] %s217_s12 }
  0x1b   : > { %s204_s14 = scalar_lea.sflag [#allocation3], %s1030_s5  ;;  %p764_p2 = pneg %p1043_p0 }
  0x1c   : > { %s775_s21 = scalar_lea.vmem %s218_s12, 1024  ;;  %s934_s22 = smov [#allocation2]  }
  0x1d   : > { %p776_p3 = scmp.ne.s32.totalorder %s218_s12, %s775_s21  ;;  %s780_s24 = sshll.u32 %s934_s22, 4  ;;  %s781_s24 = int_to_ptr.vmem [resolvable:$false] %s780_s24 }
  0x1e   : > { %s216_s10 = scalar_lea.hbm %s1198_s0, %s681_s7  ;;  %s782_s25 = scalar_lea.vmem %s781_s24, 2048 }
  0x1f   : > { %p778_p5 = pnand %p776_p3, %p764_p2  ;;  %p783_p4 = scmp.lt.s32.totalorder %s218_s12, %s781_s24 }
  0x20   : > { %p784_p7 = scmp.lt.s32.totalorder %s782_s25, %s775_s21 }
  0x21   : > { %p779_p6 = pneg %p778_p5 }
  0x22   : > { %p785_p10 = por %p784_p7, %p783_p4 }
  0x24   : > { %p786_p13 = pnand %p785_p10, %p779_p6 }
  0x26   : > { %789 = shalt.err (!%p786_p13)
}
  0x27   : > { %s935_s26 = smov 256   ;;  %s936_s8 = smov 16  }
  0x28   : > { %699 = dma.hbm_to_vmem [thread:$0]  (!%p1043_p0), %s216_s10, 1024, %s218_s12, %s204_s14, %s935_s26, %s935_s26, %s936_s8  }
  0x29   : > { %p249_p3 = scmp.lt.s32.totalorder %s932_s20, 3  ;;  %s240_s21 = scalar_lea.hbm %s1187_s1, %s681_s7 }
  0x2a   : > { %s231_s24 = scalar_lea.vmem [#allocation5], %s645_s6  ;;  %s228_s0 = scalar_lea.sflag [#allocation6], %s1030_s5 }
  0x2b   : > { %p1064_p5 = pnand %p653_p1, %p249_p3  ;;  %s241_s25 = sshll.u32 %s231_s24, 4  ;;  %s242_s25 = int_to_ptr.vmem [resolvable:$true] %s241_s25 }
  0x2c   : > { %s803_s23 = scalar_lea.vmem %s242_s25, 1024  ;;  %s937_s10 = smov [#allocation5]  }
  0x2d   : > { %p804_p6 = scmp.ne.s32.totalorder %s242_s25, %s803_s23  ;;  %s808_s12 = sshll.u32 %s937_s10, 4  ;;  %s809_s12 = int_to_ptr.vmem [resolvable:$false] %s808_s12 }
  0x2e   : > { %s810_s7 = scalar_lea.vmem %s809_s12, 2048  ;;  %p811_p10 = scmp.lt.s32.totalorder %s242_s25, %s809_s12 }
  0x2f   : > { %p806_p4 = pnand %p804_p6, %p764_p2  ;;  %p812_p1 = scmp.lt.s32.totalorder %s810_s7, %s803_s23 }
  0x31   : > { %p807_p7 = pneg %p806_p4  ;;  %p813_p13 = por %p812_p1, %p811_p10 }
  0x33   : > { %p814_p3 = pnand %p813_p13, %p807_p7 }
  0x35   : > { %817 = shalt.err (!%p814_p3)
}
  0x36   : > { %702 = dma.hbm_to_vmem [thread:$0]  (!%p1043_p0), %s240_s21, 1024, %s242_s25, %s228_s0, %s935_s26, %s935_s26, %s936_s8  }
  0x37   : > { %253 = sbr.rel (%p1064_p5) target bundleno = 330 (0x14a), region = 32  ;;  %s1079_s5 = sand.u32 (!%p1064_p5), 1, %s916_s16  }
  0x38   : > { %s654_s6 = sshll.u32 (!%p1064_p5), %s1079_s5, 6  ;;  %s256_s14 = scalar_lea.sflag (!%p1064_p5), [#allocation3], %s1079_s5 }
  0x39   : > { %s259_s9 = scalar_lea.vmem (!%p1064_p5), [#allocation2], %s654_s6 }
  0x3c   : > { %895 = dma.done.wait (%p1012_p8), %s256_s14, 1024  }
  0x3d   : > { %897 = vsyncadd (%p1012_p8), %s256_s14, 4294966272  ;;  %s265_s0 = scalar_lea.sflag [#allocation6], %s1079_s5  ;;  %s1088_s23 = scalar_lea.vmem [#allocation5], %s654_s6 }
  0x3e   : > { %899 = dma.done.wait (%p1012_p8), %s265_s0, 1024  }
  0x3f   : > { %901 = vsyncadd (%p1012_p8), %s265_s0, 4294966272  ;;  %v316_v0 = vld [vmem:[%s259_s9] sm:$0xff]  ;;  %v317_v1 = vld [vmem:[%s259_s9 + $0x8] sm:$0xff]  ;;  %v410_v9 = vlaneseq  ;;  %vm422_vm0 = vcmask 1040384   ;;  %s656_s26 = sshll.u32 %s1079_s5, 3  ;;  %s676_s8 = sshll.u32 %s924_s18, 7 }
  0x40   : > { %v318_v2 = vld [vmem:[%s259_s9 + $0x10] sm:$0xff]  ;;  %v319_v3 = vld [vmem:[%s259_s9 + $0x18] sm:$0xff]  ;;  %v320_v4 = vld [vmem:[%s259_s9 + $0x20] sm:$0xff]  ;;  %v658_v6 = vadd.f32 -1.0, %v316_v0  ;;  %v659_v7 = vadd.f32 -1.0, %v317_v1  ;;  %s299_s11 = scalar_lea.vmem [#allocation7], %s656_s26  ;;  %s1118_s25 = scalar_lea.hbm %s1189_s3, %s676_s8 }
  0x41   : > { %v321_v5 = vld [vmem:[%s259_s9 + $0x28] sm:$0xff]  ;;  %v660_v8 = vadd.f32 -1.0, %v318_v2  ;;  %v322_v10 = vld [vmem:[%s259_s9 + $0x30] sm:$0xff]  ;;  %v323_v11 = vld [vmem:[%s259_s9 + $0x38] sm:$0xff]  ;;  %v661_v12 = vadd.f32 -1.0, %v319_v3  ;;  %v662_v13 = vadd.f32 -1.0, %v320_v4 }
  0x42   : > { %v663_v14 = vadd.f32 -1.0, %v321_v5  ;;  %v664_v15 = vadd.f32 -1.0, %v322_v10  ;;  %v665_v16 = vadd.f32 -1.0, %v323_v11  ;;  %v340_v17 = vmin.f32 %v658_v6, 0.0  ;;  %v324_v19 = vld [vmem:[%s1088_s23] sm:$0xff]  ;;  %v325_v24 = vld [vmem:[%s1088_s23 + $0x8] sm:$0xff] }
  0x43   : > { %v341_v18 = vmin.f32 %v659_v7, 0.0  ;;  %v342_v20 = vmin.f32 %v660_v8, 0.0  ;;  %v343_v21 = vmin.f32 %v661_v12, 0.0  ;;  %v344_v22 = vmin.f32 %v662_v13, 0.0  ;;  %v326_v25 = vld [vmem:[%s1088_s23 + $0x10] sm:$0xff]  ;;  %v327_v29 = vld [vmem:[%s1088_s23 + $0x18] sm:$0xff] }
  0x44   : > { %v345_v23 = vmin.f32 %v663_v14, 0.0  ;;  %v346_v26 = vmin.f32 %v664_v15, 0.0  ;;  %v347_v27 = vmin.f32 %v665_v16, 0.0  ;;  %v411_v28 = vshrl.u32 %v410_v9, 7  ;;  %v328_v30 = vld [vmem:[%s1088_s23 + $0x20] sm:$0xff]  ;;  %v329_v31 = vld [vmem:[%s1088_s23 + $0x28] sm:$0xff] }
  0x45   : > { %v373_v32 = vadd.f32 %v342_v20, %v340_v17  ;;  %v382_v33 = vadd.f32 %v343_v21, %v341_v18  ;;  %v330_v34 = vld [vmem:[%s1088_s23 + $0x30] sm:$0xff]  ;;  %v331_v35 = vld [vmem:[%s1088_s23 + $0x38] sm:$0xff]  ;;  %v348_v36 = vsub.f32 0.0, %v324_v19  ;;  %v349_v37 = vsub.f32 0.0, %v325_v24  ;;  %v372_v8 = vld [vmem:[%s1188_s2] sm:$0x3] }
  0x46   : > { %v350_v38 = vsub.f32 0.0, %v326_v25  ;;  %v351_v39 = vsub.f32 0.0, %v327_v29  ;;  %v352_v40 = vsub.f32 0.0, %v328_v30  ;;  %v353_v41 = vsub.f32 0.0, %v329_v31  ;;  %s473_s21 = sshll.u32 %s299_s11, 4  ;;  %s454_s12 = scalar_lea.sflag [#allocation4], %s1079_s5  ;;  %s474_s21 = int_to_ptr.vmem [resolvable:$true] %s473_s21 }
  0x47   : > { %v374_v42 = vadd.f32 %v373_v32, %v344_v22  ;;  %v383_v43 = vadd.f32 %v382_v33, %v345_v23  ;;  %v354_v44 = vsub.f32 0.0, %v330_v34  ;;  %v355_v45 = vsub.f32 0.0, %v331_v35  ;;  %s818_s7 = scalar_lea.vmem %s474_s21, 128  ;;  %s938_s6 = smov [#allocation7]  }
  0x48   : > { %v666_v46 = vadd.f32 -1.0, %v348_v36  ;;  %v667_v47 = vadd.f32 -1.0, %v349_v37  ;;  %v668_v48 = vadd.f32 -1.0, %v350_v38  ;;  %v669_v49 = vadd.f32 -1.0, %v351_v39  ;;  %p819_p8 = scmp.ne.s32.totalorder %s474_s21, %s818_s7  ;;  %s822_s14 = sshll.u32 %s938_s6, 4  ;;  %s823_s14 = int_to_ptr.vmem [resolvable:$false] %s822_s14 }
  0x49   : > { %v375_v50 = vadd.f32 %v374_v42, %v346_v26  ;;  %v384_v51 = vadd.f32 %v383_v43, %v347_v27  ;;  %v670_v52 = vadd.f32 -1.0, %v352_v40  ;;  %v671_v53 = vadd.f32 -1.0, %v353_v41  ;;  %s824_s9 = scalar_lea.vmem %s823_s14, 256  ;;  %p825_p5 = scmp.lt.s32.totalorder %s474_s21, %s823_s14 }
  0x4a   : > { %v672_v54 = vadd.f32 -1.0, %v354_v44  ;;  %v673_v55 = vadd.f32 -1.0, %v355_v45  ;;  %v364_v56 = vmin.f32 %v666_v46, 0.0  ;;  %v365_v57 = vmin.f32 %v667_v47, 0.0  ;;  %p820_p0 = pnand %p819_p8, %p1016_p9  ;;  %p826_p6 = scmp.lt.s32.totalorder %s824_s9, %s818_s7 }
  0x4b   : > { %v376_v58 = vrot.slane %v375_v50, 4  ;;  %v385_v59 = vrot.slane %v384_v51, 4  ;;  %v366_v60 = vmin.f32 %v668_v48, 0.0  ;;  %v367_v61 = vmin.f32 %v669_v49, 0.0 }
  0x4c   : > { %v368_v62 = vmin.f32 %v670_v52, 0.0  ;;  %v369_v63 = vmin.f32 %v671_v53, 0.0  ;;  %v370_v0 = vmin.f32 %v672_v54, 0.0  ;;  %v371_v1 = vmin.f32 %v673_v55, 0.0  ;;  %p821_p2 = pneg %p820_p0  ;;  %p827_p4 = por %p826_p6, %p825_p5 }
  0x4d   : > { %v377_v2 = vadd.f32 %v376_v58, %v375_v50  ;;  %v386_v3 = vadd.f32 %v385_v59, %v384_v51  ;;  %v391_v4 = vadd.f32 %v366_v60, %v364_v56  ;;  %v400_v5 = vadd.f32 %v367_v61, %v365_v57 }
  0x4e   : > { %v412_v6 = vsub.s32 0, %v411_v28  ;;  %v416_v7 = vsub.s32 1, %v411_v28  ;;  %p828_p7 = pnand %p827_p4, %p821_p2 }
  0x4f   : > { %v378_v9 = vrot.slane %v377_v2, 2  ;;  %v387_v10 = vrot.slane %v386_v3, 2  ;;  %v392_v11 = vadd.f32 %v391_v4, %v368_v62  ;;  %v401_v12 = vadd.f32 %v400_v5, %v369_v63 }
  0x50   : > { %v413_v17 = vrot.slane %v372_v8, %v412_v6  ;;  %v417_v18 = vrot.slane %v372_v8, %v416_v7 }
  0x51   : > { %v379_v13 = vadd.f32 %v378_v9, %v377_v2  ;;  %v388_v14 = vadd.f32 %v387_v10, %v386_v3  ;;  %v393_v15 = vadd.f32 %v392_v11, %v370_v0  ;;  %v402_v16 = vadd.f32 %v401_v12, %v371_v1 }
  0x53   : > { %v380_v19 = vrot.slane %v379_v13, 1  ;;  %v389_v20 = vrot.slane %v388_v14, 1  ;;  %v394_v21 = vrot.slane %v393_v15, 4  ;;  %v403_v22 = vrot.slane %v402_v16, 4 }
  0x55   : > { %v381_v23 = vadd.f32 %v380_v19, %v379_v13  ;;  %v390_v24 = vadd.f32 %v389_v20, %v388_v14  ;;  %v395_v25 = vadd.f32 %v394_v21, %v393_v15  ;;  %v404_v26 = vadd.f32 %v403_v22, %v402_v16 }
  0x57   : > { %v420_v27 = vmul.f32 %v413_v17, %v381_v23  ;;  %v421_v28 = vmul.f32 %v417_v18, %v390_v24  ;;  %v396_v29 = vrot.slane %v395_v25, 2  ;;  %v405_v30 = vrot.slane %v404_v26, 2 }
  0x59   : > { %v423_v31 = vsel %vm422_vm0, %v420_v27, 0.0  ;;  %v424_v32 = vsel %vm422_vm0, %v421_v28, 0.0  ;;  %v397_v33 = vadd.f32 %v396_v29, %v395_v25  ;;  %v406_v34 = vadd.f32 %v405_v30, %v404_v26 }
  0x5a   : > { %v425_v35 = vadd.f32 %v424_v32, %v423_v31 }
  0x5b   : > { %v398_v36 = vrot.slane %v397_v33, 1  ;;  %v407_v37 = vrot.slane %v406_v34, 1 }
  0x5c   : > { %426 = vadd.xlane.f32.xlu0 %v425_v35 }
  0x5d   : > { %v399_v38 = vadd.f32 %v398_v36, %v397_v33  ;;  %v408_v39 = vadd.f32 %v407_v37, %v406_v34 }
  0x5f   : > { %v435_v40 = vmul.f32 %v413_v17, %v399_v38  ;;  %v436_v41 = vmul.f32 %v417_v18, %v408_v39 }
  0x61   : > { %v437_v42 = vsel %vm422_vm0, %v435_v40, 0.0  ;;  %v438_v43 = vsel %vm422_vm0, %v436_v41, 0.0 }
  0x62   : > { %v439_v44 = vadd.f32 %v438_v43, %v437_v42 }
  0x64   : > { %440 = vadd.xlane.f32.xlu0 %v439_v44 }
  0xe5   : > { %v427_v45 = vpop.xlane.xlu0 %426 }
  0xe6   : > { %v428_v46 = vrot.slane %v427_v45, 4 }
  0xe8   : > { %v429_v47 = vadd.f32 %v428_v46, %v427_v45 }
  0xea   : > { %v430_v48 = vrot.slane %v429_v47, 2 }
  0xec   : > { %v431_v49 = vadd.f32 %v430_v48, %v429_v47 }
  0xed   : > { %v441_v50 = vpop.xlane.xlu0 %440 }
  0xee   : > { %v442_v51 = vrot.slane %v441_v50, 4  ;;  %v432_v52 = vrot.slane %v431_v49, 1 }
  0xf0   : > { %v443_v53 = vadd.f32 %v442_v51, %v441_v50  ;;  %v433_v54 = vadd.f32 %v432_v52, %v431_v49 }
  0xf2   : > { %v444_v55 = vrot.slane %v443_v53, 2  ;;  %684 = vpush %v433_v54 }
  0xf4   : > { %v445_v56 = vadd.f32 %v444_v55, %v443_v53 }
  0xf6   : > { %v446_v57 = vrot.slane %v445_v56, 1 }
  0xf8   : > { %v447_v58 = vadd.f32 %v446_v57, %v445_v56 }
  0xfa   : > { %686 = vpush %v447_v58 }
 0x123   : > { %s685_s10 = spop %684 }
 0x124   : > { %v449_v59 = vstv %s685_s10 }
 0x125   : > { %450 = vst [vmem:[%s299_s11] sm:$0xff] %v449_v59 }
 0x126   : > { %831 = shalt.err (!%p828_p7)
}
 0x127   : > { %s832_s0 = scalar_lea.hbm %s1118_s25, 128  ;;  %s836_s13 = scalar_lea.hbm %s1189_s3, 256 }
 0x128   : > { %p833_p10 = scmp.ne.s32.totalorder %s1118_s25, %s832_s0  ;;  %p837_p3 = scmp.lt.s32.totalorder %s1118_s25, %s1189_s3 }
 0x129   : > { %p838_p8 = scmp.lt.s32.totalorder %s836_s13, %s832_s0 }
 0x12a   : > { %p834_p1 = pnand %p833_p10, %p1016_p9 }
 0x12b   : > { %p839_p0 = por %p838_p8, %p837_p3 }
 0x12c   : > { %p835_p13 = pneg %p834_p1 }
 0x12e   : > { %p840_p2 = pnand %p839_p0, %p835_p13 }
 0x130   : > { %843 = shalt.err (!%p840_p2)
}
 0x131   : > { %692 = dma.vmem_to_hbm [thread:$0]  (%p1016_p9), %s474_s21, 128, %s1118_s25, %s454_s12  }
 0x132   : > { %s306_s24 = scalar_lea.vmem [#allocation8], %s656_s26  ;;  %s687_s7 = spop %686 }
 0x133   : > { %s487_s10 = sshll.u32 %s306_s24, 4  ;;  %s485_s9 = scalar_lea.hbm %s1190_s4, %s676_s8  ;;  %v451_v60 = vstv %s687_s7  ;;  %s1139_s10 = int_to_ptr.vmem [resolvable:$true] %s487_s10 }
 0x134   : > { %452 = vst [vmem:[%s306_s24] sm:$0xff] %v451_v60  ;;  %s459_s0 = scalar_lea.sflag [#allocation9], %s1079_s5  ;;  %s844_s23 = scalar_lea.vmem %s1139_s10, 128 }
 0x135   : > { %p845_p5 = scmp.ne.s32.totalorder %s1139_s10, %s844_s23  ;;  %s939_s26 = smov [#allocation8]  }
 0x136   : > { %s848_s21 = sshll.u32 %s939_s26, 4  ;;  %s849_s21 = int_to_ptr.vmem [resolvable:$false] %s848_s21 }
 0x137   : > { %p846_p6 = pnand %p845_p5, %p1016_p9  ;;  %s850_s25 = scalar_lea.vmem %s849_s21, 256 }
 0x138   : > { %p851_p7 = scmp.lt.s32.totalorder %s1139_s10, %s849_s21  ;;  %p852_p10 = scmp.lt.s32.totalorder %s850_s25, %s844_s23 }
 0x139   : > { %p847_p4 = pneg %p846_p6 }
 0x13a   : > { %p853_p1 = por %p852_p10, %p851_p7 }
 0x13c   : > { %p854_p13 = pnand %p853_p1, %p847_p4 }
 0x13e   : > { %857 = shalt.err (!%p854_p13)
}
 0x13f   : > { %s858_s18 = scalar_lea.hbm %s485_s9, 128  ;;  %s862_s12 = scalar_lea.hbm %s1190_s4, 256 }
 0x140   : > { %p859_p3 = scmp.ne.s32.totalorder %s485_s9, %s858_s18  ;;  %p863_p2 = scmp.lt.s32.totalorder %s485_s9, %s1190_s4 }
 0x141   : > { %p864_p5 = scmp.lt.s32.totalorder %s862_s12, %s858_s18 }
 0x142   : > { %p860_p8 = pnand %p859_p3, %p1016_p9 }
 0x143   : > { %p865_p6 = por %p864_p5, %p863_p2 }
 0x144   : > { %p861_p0 = pneg %p860_p8 }
 0x146   : > { %p866_p12 = pnand %p865_p6, %p861_p0 }
 0x148   : > { %869 = shalt.err (!%p866_p12)
}
 0x149   : > { %693 = dma.vmem_to_hbm [thread:$0]  (%p1016_p9), %s1139_s10, 128, %s485_s9, %s459_s0  }
 0x14a PF: > { %s499_s11 = sand.u32 1, %s912_s15   ;;  %p1201_p4 = scmp.ge.s32.totalorder %s932_s20, 2 }
 0x14b   : > { %s500_s22 = scalar_lea.sflag [#allocation4], %s499_s11 }
 0x14c   : > { %p704_p7 = pnand %p1201_p4, %p1023_p11 }
 0x14e   : > { %p705_p10 = pneg %p704_p7 }
 0x150   : > { %903 = dma.done.wait (%p705_p10), %s500_s22, 128  }
 0x151   : > { %905 = vsyncadd (%p705_p10), %s500_s22, 4294967168  ;;  %s509_s24 = scalar_lea.sflag [#allocation9], %s499_s11 }
 0x152   : > { %907 = dma.done.wait (%p705_p10), %s509_s24, 128  }
 0x153   : > { %909 = vsyncadd (%p705_p10), %s509_s24, 4294967168  ;;  %s27_s20 = sadd.s32 1, %s932_s20   ;;  %s1202_s28 = sld [smem:[#allocation14_spill]] }
 0x154   : > { %p24_p12 = scmp.ge.s32.totalorder %s27_s20, 4   ;;  %s1203_s15 = smov %s916_s16 }
 0x155   : > { %s1204_s16 = smov %s920_s17  ;;  %s1205_s17 = smov %s1021_s29 }
 0x156   : > { %s1206_s18 = smov %s928_s19  ;;  %26 = sbr.rel (!%p24_p12) target bundleno = 12 (0xc), region = 110 }
 0x159   : > { %s1207_s19 = smov %s1202_s28 }
 0x15b   :  { %514 = vsyncpa [#allocation3], 1 }
 0x15c   :  { %516 = vsyncpa [#allocation3 + $0x1], 1 }
 0x15d   :  { %517 = vsyncpa [#allocation6], 1 }
 0x15e   :  { %519 = vsyncpa [#allocation6 + $0x1], 1 }
 0x15f   :  { %520 = vsyncpa [#allocation4], 1 }
 0x160   :  { %522 = vsyncpa [#allocation4 + $0x1], 1 }
 0x161   :  { %523 = vsyncpa [#allocation9], 1 }
 0x162   :  { %525 = vsyncpa [#allocation9 + $0x1], 1 }

</bundles_post_ra>
